<compile_context>
chip_gen: v6e
topology: v6e:2x2x1
jax: 0.10.0
libtpu: 0.0.40
codegen_flags: <defaults>
</compile_context>

<pallas_src>
import jax
import jax.numpy as jnp
from jax import lax
from jax.experimental import pallas as pl
from jax.experimental.pallas import tpu as pltpu

EPS = 1e-6


# ------------------------------ helpers ------------------------------------
def _budgets():
    """Generation-keyed VMEM budgets (v5e/v6e: 128 MiB phys, v7x: 64 MiB)."""
    try:
        phys = int(pltpu.get_tpu_info().vmem_capacity_bytes)
    except Exception:
        phys = 64 * 1024 * 1024
    limit = max(32 * 1024 * 1024, min(phys * 3 // 4, 96 * 1024 * 1024))
    return limit, limit // 4


def _pick_tile8(n, cap):
    """Largest multiple-of-8 divisor of n (n % 8 == 0) that is <= cap."""
    cap = max(8, (int(cap) // 8) * 8)
    best, t = 8, 8
    while t <= min(n, cap):
        if n % t == 0:
            best = t
        t += 8
    return best


def _pad_rows(x, b_pad):
    b = x.shape[0]
    if b == b_pad:
        return x
    pad = [(0, b_pad - b)] + [(0, 0)] * (x.ndim - 1)
    return jnp.pad(x, pad)


# ----------------------------- encoder kernel ------------------------------
def _encoder_kernel(emb_ref, m_ref, w_ref, b_ref, aspect_ref,
                    pt_ref, nrs_ref, psim_ref):
    emb = emb_ref[...].astype(jnp.float32)            # (bt, L, D)  bf16 -> f32
    m = m_ref[...]                                    # (D, D)
    w_fc = w_ref[...]                                 # (K, D)  nn.Linear weight
    b_fc = b_ref[...]                                 # (1, K)
    aspect = aspect_ref[...]                          # (K, D)

    ys = jnp.sum(emb, axis=1)                                            # (bt, D)
    # re-associated attention logits: w = ys @ M^T, di = <emb, w>
    w = lax.dot_general(ys, m, (((1,), (1,)), ((), ())),
                        preferred_element_type=jnp.float32)              # (bt, D)

    # keepdims softmax over tokens: di/ai stay (bt, L, 1) so ai*emb is a cheap
    # lane-broadcast (no L lane<->sublane relayout).
    di = jnp.sum(emb * w[:, None, :], axis=-1, keepdims=True)            # (bt, L, 1)
    di = di - jnp.max(di, axis=1, keepdims=True)
    e = jnp.exp(di)
    ai = e * pl.reciprocal(jnp.sum(e, axis=1, keepdims=True), approx=True)
    zs = jnp.sum(ai * emb, axis=1)                                       # (bt, D)

    logits = lax.dot_general(zs, w_fc, (((1,), (1,)), ((), ())),
                             preferred_element_type=jnp.float32) + b_fc  # (bt, K)
    logits = logits - jnp.max(logits, axis=-1, keepdims=True)
    pe = jnp.exp(logits)
    pt = pe * pl.reciprocal(jnp.sum(pe, axis=-1, keepdims=True), approx=True)

    rs = jnp.dot(pt, aspect, preferred_element_type=jnp.float32)         # (bt, D)

    inv_zs = pl.reciprocal(
        EPS + jnp.sqrt(jnp.sum(zs * zs, axis=-1, keepdims=True)), approx=True)
    inv_rs = pl.reciprocal(
        EPS + jnp.sqrt(jnp.sum(rs * rs, axis=-1, keepdims=True)), approx=True)
    nzs = zs * inv_zs
    nrs = rs * inv_rs

    pt_ref[...] = pt
    nrs_ref[...] = nrs
    psim_ref[...] = jnp.sum(nrs * nzs, axis=-1, keepdims=True)           # (bt, 1)


def _abae_encode(pos_emb, m, w_fc, b_fc, aspect, bt, vmem_limit):
    b_pad, l_len, d = pos_emb.shape
    k = aspect.shape[0]
    nt = b_pad // bt
    return pl.pallas_call(
        _encoder_kernel,
        out_shape=(jax.ShapeDtypeStruct((b_pad, k), jnp.float32),   # pos_pt
                   jax.ShapeDtypeStruct((b_pad, d), jnp.float32),   # normalized rs
                   jax.ShapeDtypeStruct((b_pad, 1), jnp.float32)),  # <nrs, nzs>
        grid_spec=pltpu.PrefetchScalarGridSpec(
            num_scalar_prefetch=0,
            grid=(nt,),
            in_specs=[
                pl.BlockSpec((bt, l_len, d), lambda i: (i, 0, 0)),
                pl.BlockSpec((d, d), lambda i: (0, 0)),
                pl.BlockSpec((k, d), lambda i: (0, 0)),
                pl.BlockSpec((1, k), lambda i: (0, 0)),
                pl.BlockSpec((k, d), lambda i: (0, 0)),
            ],
            out_specs=[
                pl.BlockSpec((bt, k), lambda i: (i, 0)),
                pl.BlockSpec((bt, d), lambda i: (i, 0)),
                pl.BlockSpec((bt, 1), lambda i: (i, 0)),
            ],
        ),
        compiler_params=pltpu.CompilerParams(
            dimension_semantics=("parallel",),
            vmem_limit_bytes=vmem_limit),
    )(pos_emb, m, w_fc, b_fc, aspect)


# --------------- hinge-loss kernel with fused in-kernel gather ---------------
def _make_hinge_kernel(n_neg, l_len, bt, b_pad):
    nbt = n_neg * bt            # rows per token index l  (multiple of 8)
    rows = l_len * nbt          # total gathered rows per grid step

    def kernel(idx_ref, nrs_ref, psim_ref, emb_hbm, partial_ref, gbuf, sem):
        i = pl.program_id(0)

        # ---- manual DMA row-gather: word_emb[HBM] -> gbuf[VMEM] ----
        # flat ordering of both idx_ref and gbuf rows is (l, n, b).
        def issue(r, c):
            li = r // nbt
            rem = r - li * nbt
            ni = rem // bt
            bl = rem - ni * bt
            g = idx_ref[li * (n_neg * b_pad) + ni * b_pad + i * bt + bl]
            pltpu.make_async_copy(emb_hbm.at[pl.ds(g, 1), :],
                                  gbuf.at[pl.ds(r, 1), :],
                                  sem.at[0]).start()
            return c

        lax.fori_loop(0, rows, issue, 0)

        def drain(r, c):
            # same-shape descriptor; only the semaphore / size matter for wait
            pltpu.make_async_copy(emb_hbm.at[pl.ds(0, 1), :],
                                  gbuf.at[pl.ds(0, 1), :],
                                  sem.at[0]).wait()
            return c

        lax.fori_loop(0, rows, drain, 0)

        # ---- hinge terms (sum over L; 1/L cancels inside the l2 norm) ----
        nrs = nrs_ref[...]                              # (bt, D), pre-normalized
        one_minus = 1.0 - psim_ref[...]                 # (bt, 1)
        total = jnp.zeros_like(one_minus)
        for ni in range(n_neg):
            acc = gbuf[ni * bt:(ni + 1) * bt, :]        # l = 0 slice (aligned)
            for li in range(1, l_len):
                off = li * nbt + ni * bt
                acc = acc + gbuf[off:off + bt, :]
            inv = pl.reciprocal(
                EPS + jnp.sqrt(jnp.sum(acc * acc, axis=-1, keepdims=True)),
                approx=True)
            neg_term = jnp.sum(nrs * acc, axis=-1, keepdims=True) * inv
            total = total + jnp.maximum(one_minus + neg_term, 0.0)
        partial_ref[...] = total                        # per-row hinge sums

    return kernel


def _abae_hinge_partials(neg_flat, nrs, psim, word_emb, bt, n_neg, l_len,
                         vmem_limit):
    b_pad, d = nrs.shape
    nt = b_pad // bt
    kernel = _make_hinge_kernel(n_neg, l_len, bt, b_pad)
    return pl.pallas_call(
        kernel,
        out_shape=jax.ShapeDtypeStruct((b_pad, 1), jnp.float32),
        grid_spec=pltpu.PrefetchScalarGridSpec(
            num_scalar_prefetch=1,                      # neg index array -> SMEM
            grid=(nt,),
            in_specs=[
                pl.BlockSpec((bt, d), lambda i, idx: (i, 0)),
                pl.BlockSpec((bt, 1), lambda i, idx: (i, 0)),
                pl.BlockSpec(memory_space=pl.ANY),      # word_emb stays in HBM
            ],
            out_specs=pl.BlockSpec((bt, 1), lambda i, idx: (i, 0)),
            scratch_shapes=[
                pltpu.VMEM((l_len * n_neg * bt, d), jnp.float32),
                pltpu.SemaphoreType.DMA((1,)),
            ],
        ),
        compiler_params=pltpu.CompilerParams(
            dimension_semantics=("parallel",),
            vmem_limit_bytes=vmem_limit),
    )(neg_flat, nrs, psim, word_emb)


# --------------------------- full ABAE forward ------------------------------
def abae_forward(pos, neg, word_emb, m, w_lin, b_lin, aspect, reg_rate,
                 stream_dtype=jnp.bfloat16):
    b, l_len = pos.shape
    _, d = word_emb.shape
    k = aspect.shape[0]
    vmem_limit, per_buffer = _budgets()

    b_pad = ((b + 7) // 8) * 8
    pos_p = _pad_rows(pos, b_pad)

    # pos path streamed as bf16; upcast to f32 right after load in-kernel.
    pos_emb = word_emb.astype(stream_dtype)[pos_p]               # (B_pad, L, D)

    # encoder tile: bf16 double-buffered input + ~3 f32 (bt,L,D) temporaries.
    enc_row_bytes = l_len * d * (2 * jnp.dtype(stream_dtype).itemsize + 3 * 4)
    cap_enc = min(512, max(8, per_buffer // max(1, enc_row_bytes)))
    if b_pad >= 16:
        cap_enc = min(cap_enc, b_pad // 2)   # >=2 grid steps -> both v7x cores
    bt_enc = _pick_tile8(b_pad, cap_enc)

    pt, nrs, psim = _abae_encode(pos_emb, m, w_lin, b_lin.reshape(1, k),
                                 aspect, bt_enc, vmem_limit)
    pt = pt[:b]
    if neg is None:
        return pt

    n_neg = neg.shape[1]
    neg_p = _pad_rows(neg, b_pad)
    # (l, n, b) flat ordering so the in-kernel L-reduction uses aligned slices.
    neg_flat = jnp.transpose(neg_p, (2, 1, 0)).reshape(-1).astype(jnp.int32)
    # TODO(synk): for very large B*N*L the scalar-prefetch index array exceeds
    # SMEM capacity; chunk it with an extra 'arbitrary' grid axis over L.

    # hinge tile: f32 gather scratch + small f32 temporaries per row.
    loss_row_bytes = n_neg * l_len * d * 4 + 4 * n_neg * d * 4 + 2 * d * 4
    cap_loss = min(512, max(8, per_buffer // max(1, loss_row_bytes)))
    if b_pad >= 16:
        cap_loss = min(cap_loss, b_pad // 2)
    bt_loss = _pick_tile8(b_pad, cap_loss)

    partials = _abae_hinge_partials(neg_flat, nrs, psim, word_emb,
                                    bt_loss, n_neg, l_len, vmem_limit)
    hinge_sum = jnp.sum(partials[:b, 0])

    # aspect-orthogonality penalty: plain JAX (too small to amortize a launch).
    nasp = aspect / (EPS + jnp.linalg.norm(aspect, axis=-1, keepdims=True))
    pen = nasp @ nasp.T - jnp.eye(k, dtype=jnp.float32)
    penalty = jnp.sqrt(jnp.sum(pen * pen))

    loss = hinge_sum / jnp.float32(b * n_neg) + jnp.float32(reg_rate) * penalty
    return pt, loss


# ------------------------------ pure-JAX ref --------------------------------
def abae_forward_ref(pos, neg, word_emb, M, W_lin, b_lin, aspect, reg_rate,
                     stream_dtype=jnp.bfloat16):
    # Reference models the same pos-path embedding quantization as the kernel
    # (bf16 storage, f32 compute) so the comparison isolates kernel error.
    we_stream = word_emb.astype(stream_dtype).astype(jnp.float32)
    pos_emb = we_stream[pos]
    ys = pos_emb.sum(axis=-2)
    di = jnp.einsum('bld,de,be->bl', pos_emb, M, ys)
    ai = jax.nn.softmax(di, axis=-1)
    zs = jnp.einsum('bl,bld->bd', ai, pos_emb)
    pt = jax.nn.softmax(zs @ W_lin.T + b_lin, axis=-1)
    rs = pt @ aspect
    if neg is None:
        return pt
    neg_emb = word_emb[neg]                       # neg path stays f32 (as kernel)
    neg_zs = neg_emb.mean(axis=-2)

    def nrm(x):
        return x / (EPS + jnp.linalg.norm(x, axis=-1, keepdims=True))

    nzs, nrs, nneg = nrm(zs), nrm(rs), nrm(neg_zs)
    loss = (1.0 - jnp.sum(nrs * nzs, -1, keepdims=True)
            + jnp.sum(nrs[:, None, :] * nneg, -1))
    loss = jnp.maximum(loss, 0.0).mean()
    nasp = nrm(aspect)
    penalty = nasp @ nasp.T - jnp.eye(aspect.shape[0], dtype=jnp.float32)
    loss = loss + reg_rate * jnp.linalg.norm(penalty)
    return pt, loss


if __name__ == "__main__":
    V, D, K = 64, 32, 4          # vocab, emb dim, aspect_size
    B, L, N = 2, 8, 3            # batch, seq len, #negative samples
    reg_rate = 0.1

    key = jax.random.PRNGKey(0)
    k1, k2, k3, k4, k5, k6 = jax.random.split(key, 6)

    word_emb = jax.random.normal(k1, (V, D), jnp.float32)
    M = jax.random.normal(k2, (D, D), jnp.float32)
    W_lin = jax.random.normal(k3, (K, D), jnp.float32) * 0.1   # nn.Linear weight
    b_lin = jax.random.normal(k4, (K,), jnp.float32) * 0.1     # nn.Linear bias
    # TODO(synk): KMeans cluster-center init replaced with deterministic rows.
    aspect = word_emb[:K]

    pos = jax.random.randint(k5, (B, L), 0, V, jnp.int32)
    neg = jax.random.randint(k6, (B, N, L), 0, V, jnp.int32)

    pt, loss = abae_forward(pos, neg, word_emb, M, W_lin, b_lin, aspect, reg_rate)
    jax.block_until_ready((pt, loss))

    pt_ref, loss_ref = abae_forward_ref(pos, neg, word_emb, M, W_lin, b_lin,
                                        aspect, reg_rate)
    # tolerance 2e-3: covers the EUP approximate-reciprocal path (~2^-12 rel)
    # used for softmax denominators / l2 norms; bf16 input rounding is modeled
    # identically in the reference.
    assert jnp.allclose(pt, pt_ref, atol=2e-3, rtol=2e-3), (pt, pt_ref)
    assert jnp.allclose(loss, loss_ref, atol=2e-3, rtol=2e-3), (loss, loss_ref)
    print("KERNEL_OK")
</pallas_src>

<mosaic_0001>
module attributes {stable_mosaic.version = 11 : i64} {
  func.func @_encoder_kernel(%arg0: i32, %arg1: memref<8x8x32xbf16, #tpu.memory_space<vmem>>, %arg2: memref<32x32xf32, #tpu.memory_space<vmem>>, %arg3: memref<4x32xf32, #tpu.memory_space<vmem>>, %arg4: memref<1x4xf32, #tpu.memory_space<vmem>>, %arg5: memref<4x32xf32, #tpu.memory_space<vmem>>, %arg6: memref<8x4xf32, #tpu.memory_space<vmem>>, %arg7: memref<8x32xf32, #tpu.memory_space<vmem>>, %arg8: memref<8x1xf32, #tpu.memory_space<vmem>>) attributes {dimension_semantics = [#tpu.dimension_semantics<parallel>], iteration_bounds = array<i64: 1>, scalar_prefetch = 0 : i64, scratch_operands = 0 : i64, tpu.core_type = #tpu.core_type<tc>, window_params = [{transform_indices = @transform_0, window_bounds = array<i64: 8, 8, 32>}, {pipeline_mode = #tpu.pipeline_mode<synchronous>, transform_indices = @transform_1, window_bounds = array<i64: 32, 32>}, {pipeline_mode = #tpu.pipeline_mode<synchronous>, transform_indices = @transform_2, window_bounds = array<i64: 4, 32>}, {pipeline_mode = #tpu.pipeline_mode<synchronous>, transform_indices = @transform_3, window_bounds = array<i64: 1, 4>}, {pipeline_mode = #tpu.pipeline_mode<synchronous>, transform_indices = @transform_4, window_bounds = array<i64: 4, 32>}, {transform_indices = @transform_5, window_bounds = array<i64: 8, 4>}, {transform_indices = @transform_6, window_bounds = array<i64: 8, 32>}, {transform_indices = @transform_7, window_bounds = array<i64: 8, 1>}]} {
    %c0 = arith.constant 0 : index
    %c0_0 = arith.constant 0 : index
    %c0_1 = arith.constant 0 : index
    %0 = vector.load %arg1[%c0, %c0_0, %c0_1] : memref<8x8x32xbf16, #tpu.memory_space<vmem>>, vector<8x8x32xbf16>
    %1 = arith.extf %0 : vector<8x8x32xbf16> to vector<8x8x32xf32>
    %c0_2 = arith.constant 0 : index
    %c0_3 = arith.constant 0 : index
    %2 = vector.load %arg2[%c0_2, %c0_3] : memref<32x32xf32, #tpu.memory_space<vmem>>, vector<32x32xf32>
    %c0_4 = arith.constant 0 : index
    %c0_5 = arith.constant 0 : index
    %3 = vector.load %arg3[%c0_4, %c0_5] : memref<4x32xf32, #tpu.memory_space<vmem>>, vector<4x32xf32>
    %c0_6 = arith.constant 0 : index
    %c0_7 = arith.constant 0 : index
    %4 = vector.load %arg4[%c0_6, %c0_7] : memref<1x4xf32, #tpu.memory_space<vmem>>, vector<1x4xf32>
    %c0_8 = arith.constant 0 : index
    %c0_9 = arith.constant 0 : index
    %5 = vector.load %arg5[%c0_8, %c0_9] : memref<4x32xf32, #tpu.memory_space<vmem>>, vector<4x32xf32>
    %cst = arith.constant dense<0.000000e+00> : vector<8x32xf32>
    %6 = vector.multi_reduction <add>, %1, %cst [1] : vector<8x8x32xf32> to vector<8x32xf32>
    %cst_10 = arith.constant dense<0.000000e+00> : vector<8x32xf32>
    %7 = tpu.matmul %6, %2, %cst_10 {dimension_numbers = #tpu.dot_dimension_numbers<[1], [1], [0], [0], [0, 0, 1, 0], [], []>} : vector<8x32xf32>, vector<32x32xf32>, vector<8x32xf32> -> vector<8x32xf32>
    %8 = vector.shape_cast %7 : vector<8x32xf32> to vector<8x1x32xf32>
    %9 = vector.broadcast %8 : vector<8x1x32xf32> to vector<8x8x32xf32>
    %10 = arith.mulf %1, %9 : vector<8x8x32xf32>
    %cst_11 = arith.constant dense<0.000000e+00> : vector<8x8xf32>
    %11 = vector.multi_reduction <add>, %10, %cst_11 [2] : vector<8x8x32xf32> to vector<8x8xf32>
    %12 = vector.shape_cast %11 : vector<8x8xf32> to vector<8x8x1xf32>
    %cst_12 = arith.constant dense<0xFF800000> : vector<8x1xf32>
    %13 = vector.multi_reduction <maximumf>, %12, %cst_12 [1] : vector<8x8x1xf32> to vector<8x1xf32>
    %14 = vector.shape_cast %13 : vector<8x1xf32> to vector<8x1x1xf32>
    %15 = vector.broadcast %14 : vector<8x1x1xf32> to vector<8x8x1xf32>
    %16 = arith.subf %12, %15 : vector<8x8x1xf32>
    %17 = math.exp %16 : vector<8x8x1xf32>
    %cst_13 = arith.constant dense<0.000000e+00> : vector<8x1xf32>
    %18 = vector.multi_reduction <add>, %17, %cst_13 [1] : vector<8x8x1xf32> to vector<8x1xf32>
    %19 = vector.shape_cast %18 : vector<8x1xf32> to vector<8x1x1xf32>
    %20 = tpu.reciprocal %19 {approx = true} : vector<8x1x1xf32> -> vector<8x1x1xf32>
    %21 = vector.broadcast %20 : vector<8x1x1xf32> to vector<8x8x1xf32>
    %22 = arith.mulf %17, %21 : vector<8x8x1xf32>
    %23 = vector.broadcast %22 : vector<8x8x1xf32> to vector<8x8x32xf32>
    %24 = arith.mulf %23, %1 : vector<8x8x32xf32>
    %cst_14 = arith.constant dense<0.000000e+00> : vector<8x32xf32>
    %25 = vector.multi_reduction <add>, %24, %cst_14 [1] : vector<8x8x32xf32> to vector<8x32xf32>
    %cst_15 = arith.constant dense<0.000000e+00> : vector<8x4xf32>
    %26 = tpu.matmul %25, %3, %cst_15 {dimension_numbers = #tpu.dot_dimension_numbers<[1], [1], [0], [0], [0, 0, 1, 0], [], []>} : vector<8x32xf32>, vector<4x32xf32>, vector<8x4xf32> -> vector<8x4xf32>
    %27 = vector.broadcast %4 : vector<1x4xf32> to vector<8x4xf32>
    %28 = arith.addf %26, %27 : vector<8x4xf32>
    %cst_16 = arith.constant dense<0xFF800000> : vector<8xf32>
    %29 = vector.multi_reduction <maximumf>, %28, %cst_16 [1] : vector<8x4xf32> to vector<8xf32>
    %30 = vector.shape_cast %29 : vector<8xf32> to vector<8x1xf32>
    %31 = vector.broadcast %30 : vector<8x1xf32> to vector<8x4xf32>
    %32 = arith.subf %28, %31 : vector<8x4xf32>
    %33 = math.exp %32 : vector<8x4xf32>
    %cst_17 = arith.constant dense<0.000000e+00> : vector<8xf32>
    %34 = vector.multi_reduction <add>, %33, %cst_17 [1] : vector<8x4xf32> to vector<8xf32>
    %35 = vector.shape_cast %34 : vector<8xf32> to vector<8x1xf32>
    %36 = tpu.reciprocal %35 {approx = true} : vector<8x1xf32> -> vector<8x1xf32>
    %37 = vector.broadcast %36 : vector<8x1xf32> to vector<8x4xf32>
    %38 = arith.mulf %33, %37 : vector<8x4xf32>
    %cst_18 = arith.constant dense<0.000000e+00> : vector<8x32xf32>
    %39 = tpu.matmul %38, %5, %cst_18 {dimension_numbers = #tpu.dot_dimension_numbers<[1], [0], [0], [1], [0, 0, 1, 1], [], []>} : vector<8x4xf32>, vector<4x32xf32>, vector<8x32xf32> -> vector<8x32xf32>
    %40 = arith.mulf %25, %25 : vector<8x32xf32>
    %cst_19 = arith.constant dense<0.000000e+00> : vector<8xf32>
    %41 = vector.multi_reduction <add>, %40, %cst_19 [1] : vector<8x32xf32> to vector<8xf32>
    %42 = vector.shape_cast %41 : vector<8xf32> to vector<8x1xf32>
    %43 = math.sqrt %42 : vector<8x1xf32>
    %cst_20 = arith.constant 9.99999997E-7 : f32
    %44 = vector.broadcast %cst_20 : f32 to vector<8x1xf32>
    %45 = arith.addf %44, %43 : vector<8x1xf32>
    %46 = tpu.reciprocal %45 {approx = true} : vector<8x1xf32> -> vector<8x1xf32>
    %47 = arith.mulf %39, %39 : vector<8x32xf32>
    %cst_21 = arith.constant dense<0.000000e+00> : vector<8xf32>
    %48 = vector.multi_reduction <add>, %47, %cst_21 [1] : vector<8x32xf32> to vector<8xf32>
    %49 = vector.shape_cast %48 : vector<8xf32> to vector<8x1xf32>
    %50 = math.sqrt %49 : vector<8x1xf32>
    %cst_22 = arith.constant 9.99999997E-7 : f32
    %51 = vector.broadcast %cst_22 : f32 to vector<8x1xf32>
    %52 = arith.addf %51, %50 : vector<8x1xf32>
    %53 = tpu.reciprocal %52 {approx = true} : vector<8x1xf32> -> vector<8x1xf32>
    %54 = vector.broadcast %46 : vector<8x1xf32> to vector<8x32xf32>
    %55 = arith.mulf %25, %54 : vector<8x32xf32>
    %56 = vector.broadcast %53 : vector<8x1xf32> to vector<8x32xf32>
    %57 = arith.mulf %39, %56 : vector<8x32xf32>
    %c0_23 = arith.constant 0 : index
    %c0_24 = arith.constant 0 : index
    %58 = vector.load %arg6[%c0_23, %c0_24] : memref<8x4xf32, #tpu.memory_space<vmem>>, vector<8x4xf32>
    tpu.vector_store %arg6[%c0_23, %c0_24], %38 {strides = array<i32>} : memref<8x4xf32, #tpu.memory_space<vmem>>, vector<8x4xf32>,
    %c0_25 = arith.constant 0 : index
    %c0_26 = arith.constant 0 : index
    %59 = vector.load %arg7[%c0_25, %c0_26] : memref<8x32xf32, #tpu.memory_space<vmem>>, vector<8x32xf32>
    tpu.vector_store %arg7[%c0_25, %c0_26], %57 {strides = array<i32>} : memref<8x32xf32, #tpu.memory_space<vmem>>, vector<8x32xf32>,
    %60 = arith.mulf %57, %55 : vector<8x32xf32>
    %cst_27 = arith.constant dense<0.000000e+00> : vector<8xf32>
    %61 = vector.multi_reduction <add>, %60, %cst_27 [1] : vector<8x32xf32> to vector<8xf32>
    %62 = vector.shape_cast %61 : vector<8xf32> to vector<8x1xf32>
    %c0_28 = arith.constant 0 : index
    %c0_29 = arith.constant 0 : index
    %63 = vector.load %arg8[%c0_28, %c0_29] : memref<8x1xf32, #tpu.memory_space<vmem>>, vector<8x1xf32>
    tpu.vector_store %arg8[%c0_28, %c0_29], %62 {strides = array<i32>} : memref<8x1xf32, #tpu.memory_space<vmem>>, vector<8x1xf32>,
    return
  }
  func.func @transform_0(%arg0: i32) -> (i32, i32, i32) {
    %c0_i32 = arith.constant 0 : i32
    %c0_i32_0 = arith.constant 0 : i32
    %c0_i32_1 = arith.constant 0 : i32
    return %arg0, %c0_i32, %c0_i32_0 : i32, i32, i32
  }
  func.func @transform_1(%arg0: i32) -> (i32, i32) {
    %c0_i32 = arith.constant 0 : i32
    %c0_i32_0 = arith.constant 0 : i32
    %c0_i32_1 = arith.constant 0 : i32
    return %c0_i32, %c0_i32_0 : i32, i32
  }
  func.func @transform_2(%arg0: i32) -> (i32, i32) {
    %c0_i32 = arith.constant 0 : i32
    %c0_i32_0 = arith.constant 0 : i32
    %c0_i32_1 = arith.constant 0 : i32
    return %c0_i32, %c0_i32_0 : i32, i32
  }
  func.func @transform_3(%arg0: i32) -> (i32, i32) {
    %c0_i32 = arith.constant 0 : i32
    %c0_i32_0 = arith.constant 0 : i32
    %c0_i32_1 = arith.constant 0 : i32
    return %c0_i32, %c0_i32_0 : i32, i32
  }
  func.func @transform_4(%arg0: i32) -> (i32, i32) {
    %c0_i32 = arith.constant 0 : i32
    %c0_i32_0 = arith.constant 0 : i32
    %c0_i32_1 = arith.constant 0 : i32
    return %c0_i32, %c0_i32_0 : i32, i32
  }
  func.func @transform_5(%arg0: i32) -> (i32, i32) {
    %c0_i32 = arith.constant 0 : i32
    %c0_i32_0 = arith.constant 0 : i32
    return %arg0, %c0_i32 : i32, i32
  }
  func.func @transform_6(%arg0: i32) -> (i32, i32) {
    %c0_i32 = arith.constant 0 : i32
    %c0_i32_0 = arith.constant 0 : i32
    return %arg0, %c0_i32 : i32, i32
  }
  func.func @transform_7(%arg0: i32) -> (i32, i32) {
    %c0_i32 = arith.constant 0 : i32
    %c0_i32_0 = arith.constant 0 : i32
    return %arg0, %c0_i32 : i32, i32
  }
}

</mosaic_0001>

<bundles_post_ra>
// kernel: tpu_custom_call.1
= control target key start
LH: loop header
LB: loop body
LE: loop exit
PB: predicated region body
PF: predicated region fallthrough
CT: control target
= control target key end

     0   :  { %13 = vsyncpa [#allocation3], 0  ;;  %s1367_s0 = inlined_call_operand.hbm [shape: bf16[8,8,32], index: 0, kind: input, shape index: {}]   ;;  %s1368_s1 = inlined_call_operand.hbm [shape: f32[32,32], index: 1, kind: input, shape index: {}]   ;;  %s1369_s2 = inlined_call_operand.hbm [shape: f32[4,32], index: 2, kind: input, shape index: {}]   ;;  %s1370_s3 = inlined_call_operand.vmem [shape: f32[1,4], index: 3, kind: input, shape index: {}]   ;;  %s1371_s4 = inlined_call_operand.vmem [shape: f32[4,32], index: 4, kind: input, shape index: {}]   ;;  %s1372_s5 = inlined_call_operand.vmem [shape: f32[8,4], index: 5, kind: output, shape index: {0}]   ;;  %s1373_s6 = inlined_call_operand.hbm [shape: f32[8,32], index: 6, kind: output, shape index: {1}]   ;;  %s1374_s7 = inlined_call_operand.vmem [shape: f32[8,1], index: 7, kind: output, shape index: {2}]  }
   0x1   :  { %14 = vsyncpa [#allocation6], 0 }
   0x2   :  { %15 = vsyncpa [#allocation4], 0  ;;  %s1085_s24 = smov [#allocation5]  }
   0x3   :  { %s33_s25 = sshll.u32 %s1085_s24, 4  ;;  %s34_s25 = int_to_ptr.vmem [resolvable:$true] %s33_s25 }
   0x4   :  { %s1007_s26 = scalar_lea.vmem %s34_s25, 512  ;;  %p1012_p1 = scmp.lt.s32.totalorder %s34_s25, %s34_s25 }
   0x5   :  { %p1008_p0 = scmp.ne.s32.totalorder %s34_s25, %s1007_s26  ;;  %p1013_p2 = scmp.lt.s32.totalorder %s1007_s26, %s1007_s26 }
   0x7   :  { %p1014_p3 = por %p1013_p2, %p1012_p1 }
   0x9   :  { %p1015_p4 = pnand %p1014_p3, %p1008_p0 }
   0xb   :  { %1018 = shalt.err (!%p1015_p4)
}
   0xc   :  { %s1086_s27 = smov 128   ;;  %s1087_s28 = smov 8  }
   0xd   :  { %39 = dma.hbm_to_vmem [thread:$0]  %s1368_s1, 512, %s34_s25, [#allocation6], %s1086_s27, %s1086_s27, %s1087_s28  }
   0xe   :  { %s1088_s8 = smov [#allocation2]  }
   0xf   :  { %s21_s9 = sshll.u32 %s1088_s8, 4  ;;  %s22_s9 = int_to_ptr.vmem [resolvable:$true] %s21_s9 }
  0x10   :  { %s1027_s10 = scalar_lea.vmem %s22_s9, 512  ;;  %p1032_p6 = scmp.lt.s32.totalorder %s22_s9, %s22_s9 }
  0x11   :  { %p1028_p5 = scmp.ne.s32.totalorder %s22_s9, %s1027_s10  ;;  %p1033_p7 = scmp.lt.s32.totalorder %s1027_s10, %s1027_s10 }
  0x13   :  { %p1034_p8 = por %p1033_p7, %p1032_p6 }
  0x15   :  { %p1035_p9 = pnand %p1034_p8, %p1028_p5 }
  0x17   :  { %1038 = shalt.err (!%p1035_p9)
}
  0x18   :  { %s1089_s11 = smov 64   ;;  %s1090_s12 = smov 4  }
  0x19   :  { %27 = dma.hbm_to_vmem [thread:$0]  %s1367_s0, 512, %s22_s9, [#allocation3], %s1089_s11, %s1089_s11, %s1090_s12  }
  0x1a   :  { %s1091_s15 = smov [#allocation7]  }
  0x1b   :  { %s46_s16 = sshll.u32 %s1091_s15, 4  ;;  %s47_s16 = int_to_ptr.vmem [resolvable:$true] %s46_s16 }
  0x1c   :  { %s1047_s1 = scalar_lea.vmem %s47_s16, 64  ;;  %p1052_p11 = scmp.lt.s32.totalorder %s47_s16, %s47_s16 }
  0x1d   :  { %p1048_p10 = scmp.ne.s32.totalorder %s47_s16, %s1047_s1  ;;  %p1053_p12 = scmp.lt.s32.totalorder %s1047_s1, %s1047_s1 }
  0x1f   :  { %p1054_p13 = por %p1053_p12, %p1052_p11 }
  0x21   :  { %p1055_p0 = pnand %p1054_p13, %p1048_p10 }
  0x23   :  { %1058 = shalt.err (!%p1055_p0)
}
  0x24   :  { %49 = dma.hbm_to_vmem [thread:$0]  %s1369_s2, 64, %s47_s16, [#allocation6]  }
  0x25   :  { %1079 = dma.done.wait [#allocation3], 512  }
  0x26   :  { %1080 = vsyncadd [#allocation3], 4294966784 }
  0x27   :  { %1081 = dma.done.wait [#allocation6], 576  }
  0x28   :  { %1082 = vsyncadd [#allocation6], 4294966720  ;;  %v1092_v0 = vmov 0.0   ;;  %vm1093_vm0 = vmmov 0   ;;  %v82_v1 = vld [vmem:[#allocation5 + $0x18] sm:$0xff]  ;;  %vm86_vm1 = vcmask 261120  }
  0x29   :  { %923 = vmatprep.subr.mxu0 %v1092_v0  ;;  %931 = vmatprep.mubr.msk.f32.mxu0 %vm1093_vm0, %v1092_v0  ;;  %v896_v2 = vld [vmem:[#allocation2] sm:$0xff]   ;;  %v911_v3 = vld [vmem:[#allocation2 + $0x8] sm:$0xff]   ;;  %v81_v4 = vld [vmem:[#allocation5 + $0x10] sm:$0xff]  ;;  %vm151_vm2 = vcmask 1041409   ;;  %vm153_vm3 = vcmask 1042434   ;;  %vm155_vm4 = vcmask 1043459  }
  0x2a   :  { %934 = vmatprep.subr.mxu1 %v1092_v0  ;;  %936 = vmatprep.mubr.msk.f32.mxu1 %vm1093_vm0, %v1092_v0  ;;  %v1153_v5 = vunpack.c.l.bf16 %v896_v2  ;;  %v1155_v6 = vunpack.c.h.bf16 %v896_v2  ;;  %v1157_v7 = vunpack.c.l.bf16 %v911_v3  ;;  %v1159_v8 = vunpack.c.h.bf16 %v911_v3  ;;  %v912_v9 = vld [vmem:[#allocation2 + $0x10] sm:$0xff]   ;;  %v913_v10 = vld [vmem:[#allocation2 + $0x18] sm:$0xff]   ;;  %v80_v23 = vld [vmem:[#allocation5 + $0x8] sm:$0xff] }
  0x2b   :  { %924 = vmatpush3.xpose.msk.msra.mxu0 %vm86_vm1, %v82_v1  ;;  %v1161_v11 = vunpack.c.l.bf16 %v912_v9  ;;  %v1163_v12 = vunpack.c.h.bf16 %v912_v9  ;;  %v1165_v13 = vunpack.c.l.bf16 %v913_v10  ;;  %v1167_v14 = vunpack.c.h.bf16 %v913_v10  ;;  %v79_v40 = vld [vmem:[#allocation5] sm:$0xff] }
  0x2c   :  { %925 = vmatprep.subr.mxu0 %v1092_v0  ;;  %v87_v15 = vsel %vm86_vm1, %v1153_v5, 0.0  ;;  %v94_v16 = vsel %vm86_vm1, %v1155_v6, 0.0  ;;  %v101_v17 = vsel %vm86_vm1, %v1157_v7, 0.0  ;;  %v108_v18 = vsel %vm86_vm1, %v1159_v8, 0.0 }
  0x2d   :  { %v88_v19 = vrot.slane %v87_v15, 4  ;;  %v95_v20 = vrot.slane %v94_v16, 4  ;;  %v102_v21 = vrot.slane %v101_v17, 4  ;;  %v109_v22 = vrot.slane %v108_v18, 4 }
  0x2e   :  { %v115_v24 = vsel %vm86_vm1, %v1161_v11, 0.0  ;;  %v122_v25 = vsel %vm86_vm1, %v1163_v12, 0.0  ;;  %v129_v26 = vsel %vm86_vm1, %v1165_v13, 0.0  ;;  %v136_v27 = vsel %vm86_vm1, %v1167_v14, 0.0 }
  0x2f   :  { %926 = vmatpush3.xpose.msk.msra.mxu0 %vm86_vm1, %v81_v4  ;;  %v89_v28 = vadd.f32 %v88_v19, %v87_v15  ;;  %v96_v29 = vadd.f32 %v95_v20, %v94_v16  ;;  %v103_v30 = vadd.f32 %v102_v21, %v101_v17  ;;  %v110_v31 = vadd.f32 %v109_v22, %v108_v18 }
  0x30   :  { %927 = vmatprep.subr.mxu0 %v1092_v0  ;;  %v116_v32 = vrot.slane %v115_v24, 4  ;;  %v123_v33 = vrot.slane %v122_v25, 4  ;;  %v130_v34 = vrot.slane %v129_v26, 4  ;;  %v137_v35 = vrot.slane %v136_v27, 4 }
  0x31   :  { %v90_v36 = vrot.slane %v89_v28, 2  ;;  %v97_v37 = vrot.slane %v96_v29, 2  ;;  %v104_v38 = vrot.slane %v103_v30, 2  ;;  %v111_v39 = vrot.slane %v110_v31, 2 }
  0x32   :  { %v117_v41 = vadd.f32 %v116_v32, %v115_v24  ;;  %v124_v42 = vadd.f32 %v123_v33, %v122_v25  ;;  %v131_v43 = vadd.f32 %v130_v34, %v129_v26  ;;  %v138_v44 = vadd.f32 %v137_v35, %v136_v27 }
  0x33   :  { %928 = vmatpush3.xpose.msk.msra.mxu0 %vm86_vm1, %v80_v23  ;;  %v91_v45 = vadd.f32 %v90_v36, %v89_v28  ;;  %v98_v46 = vadd.f32 %v97_v37, %v96_v29  ;;  %v105_v47 = vadd.f32 %v104_v38, %v103_v30  ;;  %v112_v48 = vadd.f32 %v111_v39, %v110_v31 }
  0x34   :  { %929 = vmatprep.subr.mxu0 %v1092_v0  ;;  %v118_v49 = vrot.slane %v117_v41, 2  ;;  %v125_v50 = vrot.slane %v124_v42, 2  ;;  %v132_v51 = vrot.slane %v131_v43, 2  ;;  %v139_v52 = vrot.slane %v138_v44, 2 }
  0x35   :  { %v92_v53 = vrot.slane %v91_v45, 1  ;;  %v99_v54 = vrot.slane %v98_v46, 1  ;;  %v106_v55 = vrot.slane %v105_v47, 1  ;;  %v113_v56 = vrot.slane %v112_v48, 1 }
  0x36   :  { %v119_v57 = vadd.f32 %v118_v49, %v117_v41  ;;  %v126_v58 = vadd.f32 %v125_v50, %v124_v42  ;;  %v133_v59 = vadd.f32 %v132_v51, %v131_v43  ;;  %v140_v60 = vadd.f32 %v139_v52, %v138_v44 }
  0x37   :  { %930 = vmatpush3.xpose.msk.msra.mxu0 %vm86_vm1, %v79_v40  ;;  %v93_v61 = vadd.f32 %v92_v53, %v91_v45  ;;  %v100_v62 = vadd.f32 %v99_v54, %v98_v46  ;;  %v107_v63 = vadd.f32 %v106_v55, %v105_v47  ;;  %v114_v1 = vadd.f32 %v113_v56, %v112_v48 }
  0x38   :  { %v120_v2 = vrot.slane %v119_v57, 1  ;;  %v127_v3 = vrot.slane %v126_v58, 1  ;;  %v134_v4 = vrot.slane %v133_v59, 1  ;;  %v141_v9 = vrot.slane %v140_v60, 1 }
  0x39   :  { %v152_v10 = vsel %vm151_vm2, %v100_v62, %v93_v61  ;;  %vm157_vm5 = vcmask 1044484   ;;  %vm159_vm6 = vcmask 1045509   ;;  %vm161_vm7 = vcmask 1046534  }
  0x3a   :  { %v121_v15 = vadd.f32 %v120_v2, %v119_v57  ;;  %v128_v16 = vadd.f32 %v127_v3, %v126_v58  ;;  %v135_v17 = vadd.f32 %v134_v4, %v133_v59  ;;  %v154_v18 = vsel %vm153_vm3, %v107_v63, %v152_v10 }
  0x3b   :  { %v142_v19 = vadd.f32 %v141_v9, %v140_v60  ;;  %v156_v20 = vsel %vm155_vm4, %v114_v1, %v154_v18  ;;  %vm163_vm8 = vcmask 1047559   ;;  %v1094_v25 = vmov 1966171168  }
  0x3c   :  { %v158_v21 = vsel %vm157_vm5, %v121_v15, %v156_v20  ;;  %v252_v26 = vunpack.c.l.s4 %v1094_v25  ;;  %v254_v27 = vlaneseq  ;;  %vm667_vm9 = vcmask 31744  }
  0x3d   :  { %v160_v22 = vsel %vm159_vm6, %v128_v16, %v158_v21  ;;  %v83_v16 = vld [vmem:[#allocation7] sm:$0xf]  ;;  %vm682_vm10 = vcmask 1043456  }
  0x3e   :  { %v162_v23 = vsel %vm161_vm7, %v135_v17, %v160_v22  ;;  %v253_v28 = vunpack.c.0.s8 %v252_v26  ;;  %v255_v29 = vshrl.u32 %v254_v27, 7  ;;  %935 = vmatpush3.xpose.msk.msra.mxu1 %vm86_vm1, %v83_v16 }
  0x3f   :  { %v164_v24 = vsel %vm163_vm8, %v142_v19, %v162_v23  ;;  %939 = vmatprep.subr.mxu1 %v1092_v0 }
  0x40   :  { %932 = vmatmul.mubr.msk.f32.vlgmr.msra.gmra.mxu0 %vm86_vm1, %v164_v24  ;;  %v256_v30 = vsub.s32 %v253_v28, %v255_v29  ;;  %v301_v34 = vsub.s32 0, %v255_v29 }
 0x100   :  { %v245_v31 = vpop.f32.mrf.mxu0 }
 0x101   :  { %v250_v32 = vcombine.high %v245_v31, %v245_v31  ;;  %v257_v33 = vrot.slane %v245_v31, %v256_v30 }
 0x102   :  { %v933_v35 = vpop.f32.mrf.mxu0 }
 0x103   :  { %v264_v36 = vrot.slane %v250_v32, %v256_v30  ;;  %v265_v37 = vcombine.high %v257_v33, %v257_v33  ;;  %v273_v38 = vrot.slane %v257_v33, %v256_v30 }
 0x105   :  { %v266_v39 = vcombine.high %v264_v36, %v264_v36  ;;  %v280_v40 = vrot.slane %v264_v36, %v256_v30  ;;  %v287_v41 = vrot.slane %v265_v37, %v256_v30  ;;  %v302_v42 = vrot.slane %v273_v38, %v301_v34 }
 0x106   :  { %v295_v43 = vcombine.high %v273_v38, %v273_v38 }
 0x107   :  { %v339_v44 = vmul.f32 %v1153_v5, %v302_v42  ;;  %v306_v45 = vrot.slane %v287_v41, %v301_v34  ;;  %v297_v46 = vcombine.high %v287_v41, %v287_v41  ;;  %v318_v48 = vrot.slane %v280_v40, %v301_v34 }
 0x108   :  { %v310_v47 = vrot.slane %v295_v43, %v301_v34  ;;  %v294_v49 = vrot.slane %v266_v39, %v256_v30  ;;  %v296_v53 = vcombine.high %v280_v40, %v280_v40 }
 0x109   :  { %v347_v50 = vsel %vm86_vm1, %v339_v44, 0.0  ;;  %v340_v51 = vmul.f32 %v1155_v6, %v306_v45  ;;  %v314_v52 = vrot.slane %v297_v46, %v301_v34  ;;  %v343_v60 = vmul.f32 %v1161_v11, %v318_v48 }
 0x10a   :  { %348 = vadd.xlane.f32.xlu0 %v347_v50  ;;  %v341_v54 = vmul.f32 %v1157_v7, %v310_v47  ;;  %v322_v57 = vrot.slane %v294_v49, %v301_v34  ;;  %v298_v58 = vcombine.high %v294_v49, %v294_v49  ;;  %v326_v61 = vrot.slane %v296_v53, %v301_v34 }
 0x10b   :  { %v342_v56 = vmul.f32 %v1159_v8, %v314_v52  ;;  %v350_v59 = vsel %vm86_vm1, %v340_v51, 0.0  ;;  %v359_v2 = vsel %vm86_vm1, %v343_v60, 0.0 }
 0x10c   :  { %v353_v55 = vsel %vm86_vm1, %v341_v54, 0.0  ;;  %v344_v63 = vmul.f32 %v1163_v12, %v322_v57  ;;  %v330_v1 = vrot.slane %v298_v58, %v301_v34  ;;  %v345_v3 = vmul.f32 %v1165_v13, %v326_v61 }
 0x10d   :  { %354 = vadd.xlane.f32.xlu1 %v353_v55  ;;  %v356_v62 = vsel %vm86_vm1, %v342_v56, 0.0 }
 0x10e   :  { %351 = vadd.xlane.f32.xlu0 %v350_v59  ;;  %v362_v4 = vsel %vm86_vm1, %v344_v63, 0.0  ;;  %v346_v9 = vmul.f32 %v1167_v14, %v330_v1  ;;  %v365_v10 = vsel %vm86_vm1, %v345_v3, 0.0 }
 0x110   :  { %v368_v15 = vsel %vm86_vm1, %v346_v9, 0.0 }
 0x111   :  { %357 = vadd.xlane.f32.xlu1 %v356_v62 }
 0x112   :  { %360 = vadd.xlane.f32.xlu0 %v359_v2 }
 0x115   :  { %363 = vadd.xlane.f32.xlu1 %v362_v4 }
 0x116   :  { %366 = vadd.xlane.f32.xlu0 %v365_v10 }
 0x119   :  { %369 = vadd.xlane.f32.xlu1 %v368_v15 }
 0x193   :  { %v349_v17 = vpop.xlane.xlu0 %348 }
 0x194   :  { %v371_v18 = vrot.slane %v349_v17, 4 }
 0x196   :  { %v372_v19 = vmax.f32 %v349_v17, %v371_v18  ;;  %v355_v20 = vpop.xlane.xlu1 %354 }
 0x197   :  { %v383_v21 = vrot.slane %v355_v20, 4  ;;  %v352_v22 = vpop.xlane.xlu0 %351 }
 0x198   :  { %v373_v23 = vrot.slane %v372_v19, 2  ;;  %v377_v24 = vrot.slane %v352_v22, 4 }
 0x199   :  { %v384_v25 = vmax.f32 %v355_v20, %v383_v21 }
 0x19a   :  { %v374_v26 = vmax.f32 %v372_v19, %v373_v23  ;;  %v378_v27 = vmax.f32 %v352_v22, %v377_v24  ;;  %v358_v28 = vpop.xlane.xlu1 %357 }
 0x19b   :  { %v385_v29 = vrot.slane %v384_v25, 2  ;;  %v389_v30 = vrot.slane %v358_v28, 4  ;;  %v361_v31 = vpop.xlane.xlu0 %360 }
 0x19c   :  { %v375_v32 = vrot.slane %v374_v26, 1  ;;  %v379_v33 = vrot.slane %v378_v27, 2  ;;  %v395_v34 = vrot.slane %v361_v31, 4 }
 0x19d   :  { %v386_v35 = vmax.f32 %v384_v25, %v385_v29  ;;  %v390_v36 = vmax.f32 %v358_v28, %v389_v30 }
 0x19e   :  { %v376_v37 = vmax.f32 %v374_v26, %v375_v32  ;;  %v380_v38 = vmax.f32 %v378_v27, %v379_v33  ;;  %v396_v39 = vmax.f32 %v361_v31, %v395_v34  ;;  %v364_v40 = vpop.xlane.xlu1 %363 }
 0x19f   :  { %v387_v41 = vrot.slane %v386_v35, 1  ;;  %v391_v42 = vrot.slane %v390_v36, 2  ;;  %v401_v43 = vrot.slane %v364_v40, 4  ;;  %v367_v44 = vpop.xlane.xlu0 %366 }
 0x1a0   :  { %v419_v45 = vsub.f32 %v349_v17, %v376_v37  ;;  %v381_v46 = vrot.slane %v380_v38, 1  ;;  %v397_v47 = vrot.slane %v396_v39, 2  ;;  %v407_v48 = vrot.slane %v367_v44, 4 }
 0x1a1   :  { %v388_v49 = vmax.f32 %v386_v35, %v387_v41  ;;  %v392_v50 = vmax.f32 %v390_v36, %v391_v42  ;;  %v402_v51 = vmax.f32 %v364_v40, %v401_v43 }
 0x1a2   :  { %v427_v52 = vmul.f32 1.442695, %v419_v45  ;;  %v382_v53 = vmax.f32 %v380_v38, %v381_v46  ;;  %v398_v54 = vmax.f32 %v396_v39, %v397_v47  ;;  %v408_v55 = vmax.f32 %v367_v44, %v407_v48  ;;  %v370_v56 = vpop.xlane.xlu1 %369 }
 0x1a3   :  { %v421_v57 = vsub.f32 %v355_v20, %v388_v49  ;;  %v393_v58 = vrot.slane %v392_v50, 1  ;;  %v403_v59 = vrot.slane %v402_v51, 2  ;;  %v413_v60 = vrot.slane %v370_v56, 4 }
 0x1a4   :  { %955 = vpow2.f32 %v427_v52  ;;  %v420_v61 = vsub.f32 %v352_v22, %v382_v53  ;;  %v399_v62 = vrot.slane %v398_v54, 1  ;;  %v409_v63 = vrot.slane %v408_v55, 2 }
 0x1a5   :  { %v431_v1 = vmul.f32 1.442695, %v421_v57  ;;  %v394_v2 = vmax.f32 %v392_v50, %v393_v58  ;;  %v404_v3 = vmax.f32 %v402_v51, %v403_v59  ;;  %v414_v4 = vmax.f32 %v370_v56, %v413_v60 }
 0x1a6   :  { %v429_v9 = vmul.f32 1.442695, %v420_v61  ;;  %v400_v10 = vmax.f32 %v398_v54, %v399_v62  ;;  %v410_v15 = vmax.f32 %v408_v55, %v409_v63 }
 0x1a7   :  { %957 = vpow2.f32 %v431_v1  ;;  %v422_v16 = vsub.f32 %v358_v28, %v394_v2  ;;  %v405_v17 = vrot.slane %v404_v3, 1  ;;  %v415_v18 = vrot.slane %v414_v4, 2 }
 0x1a8   :  { %959 = vpow2.f32 %v429_v9  ;;  %v423_v19 = vsub.f32 %v361_v31, %v400_v10  ;;  %v411_v20 = vrot.slane %v410_v15, 1 }
 0x1a9   :  { %v433_v21 = vmul.f32 1.442695, %v422_v16  ;;  %v406_v23 = vmax.f32 %v404_v3, %v405_v17  ;;  %v416_v24 = vmax.f32 %v414_v4, %v415_v18 }
 0x1aa   :  { %v435_v22 = vmul.f32 1.442695, %v423_v19  ;;  %v412_v25 = vmax.f32 %v410_v15, %v411_v20 }
 0x1ab   :  { %961 = vpow2.f32 %v433_v21  ;;  %v424_v26 = vsub.f32 %v364_v40, %v406_v23  ;;  %v417_v27 = vrot.slane %v416_v24, 1 }
 0x1ac   :  { %963 = vpow2.f32 %v435_v22  ;;  %v425_v29 = vsub.f32 %v367_v44, %v412_v25 }
 0x1ad   :  { %v437_v30 = vmul.f32 1.442695, %v424_v26  ;;  %v418_v32 = vmax.f32 %v416_v24, %v417_v27 }
 0x1ae   :  { %v439_v33 = vmul.f32 1.442695, %v425_v29 }
 0x1af   :  { %965 = vpow2.f32 %v437_v30  ;;  %v426_v28 = vsub.f32 %v370_v56, %v418_v32 }
 0x1b0   :  { %967 = vpow2.f32 %v439_v33 }
 0x1b1   :  { %v1216_v34 = vpop.eup %955  ;;  %v441_v31 = vmul.f32 1.442695, %v426_v28 }
 0x1b2   :  { %v443_v35 = vrot.slane %v1216_v34, 4 }
 0x1b3   :  { %969 = vpow2.f32 %v441_v31 }
 0x1b4   :  { %v1219_v36 = vpop.eup %957  ;;  %v444_v37 = vadd.f32 %v1216_v34, %v443_v35 }
 0x1b5   :  { %v1222_v38 = vpop.eup %959  ;;  %v455_v39 = vrot.slane %v1219_v36, 4 }
 0x1b6   :  { %v445_v40 = vrot.slane %v444_v37, 2  ;;  %v449_v41 = vrot.slane %v1222_v38, 4 }
 0x1b7   :  { %v456_v42 = vadd.f32 %v1219_v36, %v455_v39 }
 0x1b8   :  { %v1227_v43 = vpop.eup %961  ;;  %v446_v44 = vadd.f32 %v445_v40, %v444_v37  ;;  %v450_v45 = vadd.f32 %v1222_v38, %v449_v41 }
 0x1b9   :  { %v1230_v46 = vpop.eup %963  ;;  %v457_v47 = vrot.slane %v456_v42, 2  ;;  %v461_v48 = vrot.slane %v1227_v43, 4 }
 0x1ba   :  { %v447_v49 = vrot.slane %v446_v44, 1  ;;  %v451_v50 = vrot.slane %v450_v45, 2  ;;  %v467_v51 = vrot.slane %v1230_v46, 4 }
 0x1bb   :  { %v458_v52 = vadd.f32 %v457_v47, %v456_v42  ;;  %v462_v53 = vadd.f32 %v1227_v43, %v461_v48 }
 0x1bc   :  { %v1235_v54 = vpop.eup %965  ;;  %v448_v55 = vadd.f32 %v447_v49, %v446_v44  ;;  %v452_v56 = vadd.f32 %v451_v50, %v450_v45  ;;  %v468_v57 = vadd.f32 %v1230_v46, %v467_v51 }
 0x1bd   :  { %v1238_v58 = vpop.eup %967  ;;  %v459_v59 = vrot.slane %v458_v52, 1  ;;  %v463_v60 = vrot.slane %v462_v53, 2  ;;  %v473_v61 = vrot.slane %v1235_v54, 4 }
 0x1be   :  { %971 = vrcp.f32 %v448_v55  ;;  %v453_v62 = vrot.slane %v452_v56, 1  ;;  %v469_v63 = vrot.slane %v468_v57, 2  ;;  %v479_v1 = vrot.slane %v1238_v58, 4 }
 0x1bf   :  { %v460_v2 = vadd.f32 %v459_v59, %v458_v52  ;;  %v464_v3 = vadd.f32 %v463_v60, %v462_v53  ;;  %v474_v4 = vadd.f32 %v1235_v54, %v473_v61 }
 0x1c0   :  { %v1243_v9 = vpop.eup %969  ;;  %v454_v10 = vadd.f32 %v453_v62, %v452_v56  ;;  %v470_v15 = vadd.f32 %v469_v63, %v468_v57  ;;  %v480_v16 = vadd.f32 %v1238_v58, %v479_v1 }
 0x1c1   :  { %973 = vrcp.f32 %v460_v2  ;;  %v465_v17 = vrot.slane %v464_v3, 1  ;;  %v475_v18 = vrot.slane %v474_v4, 2  ;;  %v485_v19 = vrot.slane %v1243_v9, 4 }
 0x1c2   :  { %975 = vrcp.f32 %v454_v10  ;;  %v471_v20 = vrot.slane %v470_v15, 1  ;;  %v481_v21 = vrot.slane %v480_v16, 2 }
 0x1c3   :  { %v466_v23 = vadd.f32 %v465_v17, %v464_v3  ;;  %v476_v24 = vadd.f32 %v475_v18, %v474_v4  ;;  %v486_v22 = vadd.f32 %v1243_v9, %v485_v19 }
 0x1c4   :  { %v472_v25 = vadd.f32 %v471_v20, %v470_v15  ;;  %v482_v26 = vadd.f32 %v481_v21, %v480_v16 }
 0x1c5   :  { %v477_v27 = vrot.slane %v476_v24, 1  ;;  %v487_v29 = vrot.slane %v486_v22, 2  ;;  %977 = vrcp.f32 %v466_v23 }
 0x1c6   :  { %v483_v30 = vrot.slane %v482_v26, 1  ;;  %979 = vrcp.f32 %v472_v25 }
 0x1c7   :  { %v478_v32 = vadd.f32 %v477_v27, %v476_v24  ;;  %v488_v33 = vadd.f32 %v487_v29, %v486_v22 }
 0x1c8   :  { %v484_v28 = vadd.f32 %v483_v30, %v482_v26 }
 0x1c9   :  { %v489_v31 = vrot.slane %v488_v33, 1  ;;  %981 = vrcp.f32 %v478_v32 }
 0x1ca   :  { %983 = vrcp.f32 %v484_v28 }
 0x1cb   :  { %v972_v35 = vpop.eup %971  ;;  %v490_v37 = vadd.f32 %v489_v31, %v488_v33 }
 0x1cc   :  { %v499_v39 = vmul.f32 %v972_v35, %v1216_v34 }
 0x1cd   :  { %985 = vrcp.f32 %v490_v37 }
 0x1ce   :  { %v974_v40 = vpop.eup %973  ;;  %v507_v41 = vmul.f32 %v1153_v5, %v499_v39 }
 0x1cf   :  { %v976_v42 = vpop.eup %975  ;;  %v501_v44 = vmul.f32 %v974_v40, %v1219_v36 }
 0x1d0   :  { %v500_v45 = vmul.f32 %v976_v42, %v1222_v38  ;;  %v515_v47 = vsel %vm86_vm1, %v507_v41, 0.0 }
 0x1d1   :  { %v509_v48 = vmul.f32 %v1157_v7, %v501_v44  ;;  %v516_v49 = vrot.slane %v515_v47, 4 }
 0x1d2   :  { %v978_v50 = vpop.eup %977  ;;  %v508_v51 = vmul.f32 %v1155_v6, %v500_v45 }
 0x1d3   :  { %v980_v52 = vpop.eup %979  ;;  %v502_v34 = vmul.f32 %v978_v50, %v1227_v43  ;;  %v517_v53 = vadd.f32 %v516_v49, %v515_v47  ;;  %v529_v55 = vsel %vm86_vm1, %v509_v48, 0.0 }
 0x1d4   :  { %v503_v5 = vmul.f32 %v980_v52, %v1230_v46  ;;  %v522_v36 = vsel %vm86_vm1, %v508_v51, 0.0  ;;  %v530_v56 = vrot.slane %v529_v55, 4 }
 0x1d5   :  { %v510_v38 = vmul.f32 %v1159_v8, %v502_v34  ;;  %v518_v57 = vrot.slane %v517_v53, 2  ;;  %v523_v59 = vrot.slane %v522_v36, 4 }
 0x1d6   :  { %v982_v7 = vpop.eup %981  ;;  %v511_v60 = vmul.f32 %v1161_v11, %v503_v5  ;;  %v531_v61 = vadd.f32 %v530_v56, %v529_v55 }
 0x1d7   :  { %v984_v6 = vpop.eup %983  ;;  %v504_v62 = vmul.f32 %v982_v7, %v1235_v54  ;;  %v519_v43 = vadd.f32 %v518_v57, %v517_v53  ;;  %v524_v63 = vadd.f32 %v523_v59, %v522_v36  ;;  %v536_v1 = vsel %vm86_vm1, %v510_v38, 0.0 }
 0x1d8   :  { %v505_v46 = vmul.f32 %v984_v6, %v1238_v58  ;;  %v532_v2 = vrot.slane %v531_v61, 2  ;;  %v537_v3 = vrot.slane %v536_v1, 4  ;;  %v543_v4 = vsel %vm86_vm1, %v511_v60, 0.0 }
 0x1d9   :  { %v512_v8 = vmul.f32 %v1163_v12, %v504_v62  ;;  %v525_v10 = vrot.slane %v524_v63, 2  ;;  %v544_v15 = vrot.slane %v543_v4, 4  ;;  %v520_v17 = vrot.slane %v519_v43, 1 }
 0x1da   :  { %v986_v16 = vpop.eup %985  ;;  %v513_v11 = vmul.f32 %v1165_v13, %v505_v46  ;;  %v533_v18 = vadd.f32 %v532_v2, %v531_v61  ;;  %v538_v54 = vadd.f32 %v537_v3, %v536_v1 }
 0x1db   :  { %v506_v19 = vmul.f32 %v986_v16, %v1243_v9  ;;  %v526_v20 = vadd.f32 %v525_v10, %v524_v63  ;;  %v545_v21 = vadd.f32 %v544_v15, %v543_v4  ;;  %v550_v24 = vsel %vm86_vm1, %v512_v8, 0.0  ;;  %v890_v8 = vld [vmem:[%s1370_s3] ss:$0 sm:$0xff] }
 0x1dc   :  { %v534_v23 = vrot.slane %v533_v18, 1  ;;  %v539_v58 = vrot.slane %v538_v54, 2  ;;  %v557_v22 = vsel %vm86_vm1, %v513_v11, 0.0  ;;  %v551_v27 = vrot.slane %v550_v24, 4 }
 0x1dd   :  { %v514_v12 = vmul.f32 %v1167_v14, %v506_v19  ;;  %v527_v25 = vrot.slane %v526_v20, 1  ;;  %v546_v26 = vrot.slane %v545_v21, 2  ;;  %v1271_v29 = vadd.f32 %v520_v17, %v519_v43 }
 0x1de   :  { %v540_v13 = vadd.f32 %v539_v58, %v538_v54  ;;  %v558_v30 = vrot.slane %v557_v22, 4  ;;  %v552_v33 = vadd.f32 %v551_v27, %v550_v24  ;;  %v1276_v31 = vadd.f32 %v534_v23, %v533_v18 }
 0x1df   :  { %v1273_v32 = vadd.f32 %v527_v25, %v526_v20  ;;  %v547_v9 = vadd.f32 %v546_v26, %v545_v21  ;;  %v564_v28 = vsel %vm86_vm1, %v514_v12, 0.0  ;;  %v756_v6 = vmul.f32 %v1271_v29, %v1271_v29  ;;  %v85_v12 = vld [vmem:[%s1371_s4] sm:$0xf]  ;;  %s1095_s4 = smov [#allocation8]  }
 0x1e0   :  { %v541_v35 = vrot.slane %v540_v13, 1  ;;  %v559_v37 = vadd.f32 %v558_v30, %v557_v22  ;;  %v565_v39 = vrot.slane %v564_v28, 4  ;;  %v553_v14 = vrot.slane %v552_v33, 2 }
 0x1e1   :  { %v548_v40 = vrot.slane %v547_v9, 1  ;;  %v585_v41 = vsel %vm151_vm2, %v1273_v32, %v1271_v29  ;;  %v757_v61 = vmul.f32 %v1273_v32, %v1273_v32  ;;  %v758_v43 = vmul.f32 %v1276_v31, %v1276_v31 }
 0x1e2   :  { %v1281_v42 = vadd.f32 %v541_v35, %v540_v13  ;;  %v560_v44 = vrot.slane %v559_v37, 2  ;;  %v566_v45 = vadd.f32 %v565_v39, %v564_v28  ;;  %v586_v47 = vsel %vm153_vm3, %v1276_v31, %v585_v41 }
 0x1e3   :  { %v1285_v48 = vadd.f32 %v548_v40, %v547_v9  ;;  %v554_v49 = vadd.f32 %v553_v14, %v552_v33  ;;  %v772_v62 = vsel %vm151_vm2, %v757_v61, %v756_v6 }
 0x1e4   :  { %v561_v50 = vadd.f32 %v560_v44, %v559_v37  ;;  %v567_v51 = vrot.slane %v566_v45, 2  ;;  %v587_v52 = vsel %vm155_vm4, %v1281_v42, %v586_v47  ;;  %v759_v63 = vmul.f32 %v1281_v42, %v1281_v42 }
 0x1e5   :  { %v555_v34 = vrot.slane %v554_v49, 1  ;;  %v588_v5 = vsel %vm157_vm5, %v1285_v48, %v587_v52  ;;  %v773_v1 = vsel %vm153_vm3, %v758_v43, %v772_v62  ;;  %v760_v46 = vmul.f32 %v1285_v48, %v1285_v48 }
 0x1e6   :  { %v562_v53 = vrot.slane %v561_v50, 1  ;;  %v568_v55 = vadd.f32 %v567_v51, %v566_v45 }
 0x1e7   :  { %v1291_v36 = vadd.f32 %v555_v34, %v554_v49 }
 0x1e8   :  { %v1293_v56 = vadd.f32 %v562_v53, %v561_v50  ;;  %v569_v38 = vrot.slane %v568_v55, 1 }
 0x1e9   :  { %v589_v57 = vsel %vm159_vm6, %v1291_v36, %v588_v5  ;;  %v761_v2 = vmul.f32 %v1291_v36, %v1291_v36 }
 0x1ea   :  { %v1297_v59 = vadd.f32 %v569_v38, %v568_v55  ;;  %v590_v7 = vsel %vm161_vm7, %v1293_v56, %v589_v57  ;;  %v762_v4 = vmul.f32 %v1293_v56, %v1293_v56 }
 0x1ec   :  { %v591_v60 = vsel %vm163_vm8, %v1297_v59, %v590_v7  ;;  %v763_v16 = vmul.f32 %v1297_v59, %v1297_v59 }
 0x1ed   :  { %937 = vmatmul.mubr.msk.f32.vlgmr.msra.gmra.mxu1 %vm86_vm1, %v591_v60 }
 0x1ee   :  { %941 = vmatprep.mubr.msk.f32.mxu1 %vm1093_vm0, %v1092_v0  ;;  %v774_v0 = vsel %vm155_vm4, %v759_v63, %v773_v1  ;;  %940 = vmatpush3.msk.msra.mxu1 %vm682_vm10, %v85_v12 }
 0x1ef   :  { %v775_v3 = vsel %vm157_vm5, %v760_v46, %v774_v0 }
 0x1f0   :  { %v776_v10 = vsel %vm159_vm6, %v761_v2, %v775_v3 }
 0x1f1   :  { %v777_v17 = vsel %vm161_vm7, %v762_v4, %v776_v10 }
 0x1f2   :  { %v778_v19 = vsel %vm163_vm8, %v763_v16, %v777_v17 }
 0x1f3   :  { %v780_v20 = vsel %vm86_vm1, %v778_v19, 0.0 }
 0x2ad   :  { %v663_v15 = vpop.f32.mrf.mxu1 }
 0x2ae   :  { %v664_v11 = vadd.f32 %v890_v8, %v663_v15 }
 0x2af   :  { %v938_v18 = vpop.f32.mrf.mxu1 }
 0x2b0   :  { %v668_v54 = vsel %vm667_vm9, %v664_v11, -inf }
 0x2b1   :  { %669 = vmax.xlane.f32.xlu0 %v668_v54 }
 0x2b5   :  { %781 = vadd.xlane.f32.xlu0 %v780_v20 }
 0x33a   :  { %v670_v21 = vpop.xlane.xlu0 %669 }
 0x33b   :  { %v671_v23 = vsub.f32 %v664_v11, %v670_v21 }
 0x33d   :  { %v672_v58 = vmul.f32 1.442695, %v671_v23 }
 0x33e   :  { %v782_v28 = vpop.xlane.xlu0 %781 }
 0x33f   :  { %987 = vpow2.f32 %v672_v58  ;;  %vm785_vm11 = vcmp.eq.f32.partialorder %v782_v28, inf  ;;  %v788_v40 = vand.u32 2147483648, %v782_v28  ;;  %vm787_vm12 = vcmp.eq.f32.partialorder %v782_v28, 0.0 }
 0x34c   :  { %v988_v24 = vpop.eup %987 }
 0x34d   :  { %v674_v22 = vsel %vm667_vm9, %v988_v24, 0.0 }
 0x34e   :  { %675 = vadd.xlane.f32.xlu1 %v674_v22 }
 0x3d7   :  { %v676_v25 = vpop.xlane.xlu1 %675 }
 0x3d8   :  { %989 = vrcp.f32 %v676_v25 }
 0x3d9   :  { %991 = vrsqrt.f32 %v782_v28 }
 0x3e5   :  { %v990_v26 = vpop.eup %989 }
 0x3e6   :  { %v678_v27 = vmul.f32 %v990_v26, %v988_v24  ;;  %v992_v35 = vpop.eup %991 }
 0x3e7   :  { %v784_v37 = vmul.f32 %v992_v35, %v782_v28 }
 0x3e8   :  { %942 = vmatmul.mubr.msk.f32.vlgmr.msra.gmra.mxu1 %vm667_vm9, %v678_v27  ;;  %830 = vst.msk [vmem:[%s1372_s5] sm:$0xff] %vm667_vm9, %v678_v27  ;;  %s869_s5 = sshll.u32 %s1095_s4, 4  ;;  %s870_s5 = int_to_ptr.vmem [resolvable:$true] %s869_s5 }
 0x3e9   :  { %v786_v39 = vsel %vm785_vm11, %v782_v28, %v784_v37  ;;  %s1059_s22 = scalar_lea.vmem %s870_s5, 128  ;;  %p1064_p2 = scmp.lt.s32.totalorder %s870_s5, %s870_s5 }
 0x3ea   :  { %v789_v14 = vsel %vm787_vm12, %v788_v40, %v786_v39  ;;  %p1060_p1 = scmp.ne.s32.totalorder %s870_s5, %s1059_s22  ;;  %p1065_p3 = scmp.lt.s32.totalorder %s1059_s22, %s1059_s22 }
 0x3eb   :  { %v790_v41 = vadd.f32 1e-06, %v789_v14 }
 0x3ec   :  { %p1066_p4 = por %p1065_p3, %p1064_p2 }
 0x3ed   :  { %993 = vrcp.f32 %v790_v41 }
 0x3ee   :  { %p1067_p5 = pnand %p1066_p4, %p1060_p1 }
 0x3fa   :  { %v994_v45 = vpop.eup %993 }
 0x3fb   :  { %v806_v47 = vrot.slane %v994_v45, 1  ;;  %v807_v49 = vrot.slane %v994_v45, 2  ;;  %v808_v34 = vrot.slane %v994_v45, 3  ;;  %v821_v38 = vmul.f32 %v994_v45, %v1271_v29 }
 0x3fc   :  { %v809_v7 = vrot.slane %v994_v45, 4  ;;  %v810_v43 = vrot.slane %v994_v45, 5  ;;  %v811_v46 = vrot.slane %v994_v45, 6  ;;  %v812_v3 = vrot.slane %v994_v45, 7 }
 0x3fd   :  { %v822_v50 = vmul.f32 %v806_v47, %v1273_v32  ;;  %v823_v51 = vmul.f32 %v807_v49, %v1276_v31  ;;  %v824_v6 = vmul.f32 %v808_v34, %v1281_v42 }
 0x3fe   :  { %v825_v31 = vmul.f32 %v809_v7, %v1285_v48  ;;  %v826_v29 = vmul.f32 %v810_v43, %v1291_v36  ;;  %v827_v4 = vmul.f32 %v811_v46, %v1293_v56  ;;  %v828_v10 = vmul.f32 %v812_v3, %v1297_v59 }
 0x3ff   :  { %v840_v53 = vrot.slane %v822_v50, 7  ;;  %v842_v60 = vrot.slane %v823_v51, 6  ;;  %v844_v1 = vrot.slane %v824_v6, 5 }
 0x400   :  { %v846_v2 = vrot.slane %v825_v31, 4  ;;  %v848_v8 = vrot.slane %v826_v29, 3  ;;  %v850_v48 = vrot.slane %v827_v4, 2  ;;  %v852_v17 = vrot.slane %v828_v10, 1 }
 0x401   :  { %v841_v62 = vsel %vm151_vm2, %v840_v53, %v821_v38 }
 0x402   :  { %v843_v63 = vsel %vm153_vm3, %v842_v60, %v841_v62 }
 0x403   :  { %v845_v0 = vsel %vm155_vm4, %v844_v1, %v843_v63 }
 0x404   :  { %v847_v42 = vsel %vm157_vm5, %v846_v2, %v845_v0 }
 0x405   :  { %v849_v15 = vsel %vm159_vm6, %v848_v8, %v847_v42 }
 0x406   :  { %v851_v16 = vsel %vm161_vm7, %v850_v48, %v849_v15 }
 0x407   :  { %v853_v36 = vsel %vm163_vm8, %v852_v17, %v851_v16 }
 0x4a8   :  { %v752_v13 = vpop.f32.mrf.mxu1 }
 0x4a9   :  { %v792_v30 = vmul.f32 %v752_v13, %v752_v13 }
 0x4aa   :  { %v943_v9 = vpop.f32.mrf.mxu1 }
 0x4ab   :  { %v793_v33 = vsel %vm86_vm1, %v792_v30, 0.0 }
 0x4ac   :  { %794 = vadd.xlane.f32.xlu1 %v793_v33 }
 0x535   :  { %v795_v44 = vpop.xlane.xlu1 %794 }
 0x536   :  { %995 = vrsqrt.f32 %v795_v44  ;;  %vm798_vm13 = vcmp.eq.f32.partialorder %v795_v44, inf  ;;  %v801_v5 = vand.u32 2147483648, %v795_v44  ;;  %vm800_vm14 = vcmp.eq.f32.partialorder %v795_v44, 0.0 }
 0x543   :  { %v996_v52 = vpop.eup %995 }
 0x544   :  { %v797_v55 = vmul.f32 %v996_v52, %v795_v44 }
 0x546   :  { %v799_v57 = vsel %vm798_vm13, %v795_v44, %v797_v55 }
 0x547   :  { %v802_v61 = vsel %vm800_vm14, %v801_v5, %v799_v57 }
 0x548   :  { %v803_v32 = vadd.f32 1e-06, %v802_v61 }
 0x54a   :  { %997 = vrcp.f32 %v803_v32 }
 0x557   :  { %v998_v11 = vpop.eup %997 }
 0x558   :  { %v829_v18 = vmul.f32 %v998_v11, %v752_v13 }
 0x55a   :  { %v855_v54 = vmul.f32 %v853_v36, %v829_v18  ;;  %831 = vst.msk [vmem:[#allocation8] sm:$0xff] %vm86_vm1, %v829_v18 }
 0x55c   :  { %v856_v56 = vsel %vm86_vm1, %v855_v54, 0.0 }
 0x55d   :  { %857 = vadd.xlane.f32.xlu0 %v856_v56 }
 0x55e   :  { %1070 = shalt.err (!%p1067_p5)
}
 0x55f   :  { %872 = dma.vmem_to_hbm [thread:$0]  %s870_s5, 128, %s1373_s6, [#allocation4]   ;;  %vm859_vm15 = vcmask 7168  }
 0x5e6   :  { %v858_v59 = vpop.xlane.xlu0 %857 }
 0x5e7   :  { %860 = vst.msk [vmem:[%s1374_s7] sm:$0xff] %vm859_vm15, %v858_v59 }
 0x5e8   :  { %1083 = dma.done.wait [#allocation4], 128  }
 0x5e9   :  { %1084 = vsyncadd [#allocation4], 4294967168 }
 0x5ea   :  { %882 = vsyncpa [#allocation3], 1 }
 0x5eb   :  { %883 = vsyncpa [#allocation6], 1 }
 0x5ec   :  { %884 = vsyncpa [#allocation4], 1 }

</bundles_post_ra>
